<compile_context>
chip_gen: v5e
topology: v5e:2x2
jax: 0.10.0
libtpu: 0.0.40
codegen_flags: <defaults>
</compile_context>

<pallas_src>
import jax
import jax.numpy as jnp
from jax.experimental import pallas as pl
from jax.experimental.pallas import tpu as pltpu

_LANES = 1024                            # lane-dense last dim (8 * 128)
_TARGET_BLOCK_BYTES = 4 * 1024 * 1024    # ~4 MiB/block; 2 bufs x (in+out) = 16 MiB live


def _copy_kernel(x_ref, o_ref):
    # Whole-tile load/store (pure copy — abstract forward exercised as identity).
    o_ref[...] = x_ref[...]


def _pallas_identity_copy(x: jax.Array) -> jax.Array:
    """Identity via an explicit HBM->VMEM->HBM Pallas copy (debug/exercise path)."""
    orig_shape = x.shape
    n = x.size
    itemsize = jnp.dtype(x.dtype).itemsize
    # Sublane packing multiple: 8 for 32-bit, 16 for 16-bit, 32 for 8-bit dtypes.
    sublane = max(8, 32 // max(1, itemsize))

    # Pad only to a multiple of _LANES (<= _LANES-1 extra elements); skip
    # entirely when n is already lane-aligned (the common NN case).
    padded_n = pl.cdiv(n, _LANES) * _LANES
    flat = x.reshape(-1)
    if padded_n != n:
        flat = jnp.pad(flat, (0, padded_n - n))
    rows = padded_n // _LANES
    x2d = flat.reshape(rows, _LANES)

    # Tile rows: ~_TARGET_BLOCK_BYTES per block, rounded down to the sublane
    # multiple.  Small inputs collapse to a single full-array block (always
    # legal).  Ragged last block (rows % tile_rows != 0) is masked by Pallas.
    tile_rows = (_TARGET_BLOCK_BYTES // (_LANES * itemsize)) // sublane * sublane
    tile_rows = max(sublane, tile_rows)
    if tile_rows >= rows:
        tile_rows = rows
    grid_len = pl.cdiv(rows, tile_rows)

    out2d = pl.pallas_call(
        _copy_kernel,
        out_shape=jax.ShapeDtypeStruct(x2d.shape, x2d.dtype),
        grid=(grid_len,),
        in_specs=[pl.BlockSpec((tile_rows, _LANES), lambda i: (i, 0))],
        out_specs=pl.BlockSpec((tile_rows, _LANES), lambda i: (i, 0)),
        # Output aliases the (intermediate) input buffer: no second N-byte
        # HBM allocation for an identity op.
        input_output_aliases={0: 0},
        # Purely memory-bound hint for XLA's scheduler.
        cost_estimate=pl.CostEstimate(
            flops=0, transcendentals=0,
            bytes_accessed=2 * padded_n * itemsize),
        compiler_params=pltpu.CompilerParams(
            # Shards the grid axis across TensorCores on multi-TC chips;
            # harmless on single-TC v5e/v6e.
            dimension_semantics=("parallel",),
            # 16 MiB live buffers << 32 MiB limit on all generations.
            vmem_limit_bytes=32 * 1024 * 1024,
        ),
    )(x2d)

    out_flat = out2d.reshape(-1)
    if padded_n != n:
        out_flat = out_flat[:n]
    return out_flat.reshape(orig_shape)


def module_forward(x: jax.Array, train=None, *, _exercise_copy_kernel: bool = False) -> jax.Array:
    """Pallas equivalent of Module.forward (abstract -> identity pass-through).

    Default path returns `x` directly (zero HBM traffic).  Set
    `_exercise_copy_kernel=True` to route through the Pallas copy kernel so the
    HBM -> VMEM -> HBM data path is exercised (debug only).
    """
    if x.size == 0 or not _exercise_copy_kernel:
        return x
    return _pallas_identity_copy(x)


if __name__ == "__main__":
    key = jax.random.PRNGKey(0)

    # Small NCHW input consistent with a typical vision-style subclass.
    x = jax.random.normal(key, (2, 4, 16, 16), dtype=jnp.float32)

    # Default (optimal) path: identity short-circuit, no HBM round trip.
    y_fast = module_forward(x, train=False)
    jax.block_until_ready(y_fast)
    assert y_fast.shape == x.shape and y_fast.dtype == x.dtype
    assert bool(jnp.allclose(y_fast, x)), "identity fast-path mismatch"

    # Exercise the Pallas copy kernel (lane-aligned case: 2048 elems, no pad).
    y = module_forward(x, train=False, _exercise_copy_kernel=True)
    jax.block_until_ready(y)
    assert y.shape == x.shape and y.dtype == x.dtype
    assert bool(jnp.allclose(y, x)), "pallas copy mismatch"

    # Ragged shape (945 elements, not a multiple of 1024) to exercise the
    # minimal-pad + masked-block path.
    x2 = jax.random.normal(jax.random.PRNGKey(1), (3, 5, 7, 9), dtype=jnp.float32)
    y2 = module_forward(x2, train=False, _exercise_copy_kernel=True)
    jax.block_until_ready(y2)
    assert y2.shape == x2.shape and bool(jnp.allclose(y2, x2)), "ragged-shape mismatch"

    print("KERNEL_OK")
</pallas_src>

<mosaic_0001>
module attributes {stable_mosaic.version = 11 : i64} {
  func.func @_copy_kernel(%arg0: i32, %arg1: memref<2x1024xf32, #tpu.memory_space<vmem>>, %arg2: memref<2x1024xf32, #tpu.memory_space<vmem>>) attributes {dimension_semantics = [#tpu.dimension_semantics<parallel>], iteration_bounds = array<i64: 1>, scalar_prefetch = 0 : i64, scratch_operands = 0 : i64, tpu.core_type = #tpu.core_type<tc>, window_params = [{transform_indices = @transform_0, window_bounds = array<i64: 2, 1024>}, {transform_indices = @transform_1, window_bounds = array<i64: 2, 1024>}]} {
    %c0 = arith.constant 0 : index
    %c0_0 = arith.constant 0 : index
    %0 = vector.load %arg1[%c0, %c0_0] : memref<2x1024xf32, #tpu.memory_space<vmem>>, vector<2x1024xf32>
    %c0_1 = arith.constant 0 : index
    %c0_2 = arith.constant 0 : index
    %1 = vector.load %arg2[%c0_1, %c0_2] : memref<2x1024xf32, #tpu.memory_space<vmem>>, vector<2x1024xf32>
    tpu.vector_store %arg2[%c0_1, %c0_2], %0 {strides = array<i32>} : memref<2x1024xf32, #tpu.memory_space<vmem>>, vector<2x1024xf32>,
    return
  }
  func.func @transform_0(%arg0: i32) -> (i32, i32) {
    %c0_i32 = arith.constant 0 : i32
    %c0_i32_0 = arith.constant 0 : i32
    return %arg0, %c0_i32 : i32, i32
  }
  func.func @transform_1(%arg0: i32) -> (i32, i32) {
    %c0_i32 = arith.constant 0 : i32
    %c0_i32_0 = arith.constant 0 : i32
    return %arg0, %c0_i32 : i32, i32
  }
}

</mosaic_0001>

<bundles_post_ra>
// kernel: tpu_custom_call.1
= control target key start
LH: loop header
LB: loop body
LE: loop exit
PB: predicated region body
PF: predicated region fallthrough
CT: control target
= control target key end

     0   :  { %6 = vsyncpa [#allocation3], 0  ;;  %s116_s0 = inlined_call_operand.hbm [shape: f32[2,1024], index: 0, kind: input, shape index: {}, may-alias: {0,1}]   ;;  %s117_s1 = inlined_call_operand.hbm [shape: f32[2,1024], index: 1, kind: output, shape index: {}, may-alias: {0,1}]  }
   0x1   :  { %7 = vsyncpa [#allocation4], 0  ;;  %s13_s8 = sshll.u32 %s116_s0, 4  ;;  %s98_s9 = smov [#allocation2]   ;;  %s14_s8 = int_to_ptr.hbm [resolvable:$true] %s13_s8 }
   0x2   :  { %s15_s10 = sshll.u32 %s98_s9, 4  ;;  %s16_s10 = int_to_ptr.vmem [resolvable:$true] %s15_s10 }
   0x3   :  { %18 = dma.hbm_to_vmem [thread:$0]  %s14_s8, 256, %s16_s10, [#allocation3]  }
   0x4   :  { %94 = dma.done.wait [#allocation3], 256  }
   0x5   :  { %95 = vsyncadd [#allocation3], 4294967040  ;;  %s99_s11 = smov [#allocation5]   ;;  %s34_s15 = sshll.u32 %s117_s1, 4  ;;  %v23_v0 = vld [vmem:[#allocation2] sm:$0xff]  ;;  %v24_v1 = vld [vmem:[#allocation2 + $0x8] sm:$0xff]  ;;  %s35_s15 = int_to_ptr.hbm [resolvable:$true] %s34_s15 }
   0x6   :  { %s32_s12 = sshll.u32 %s99_s11, 4  ;;  %25 = vst [vmem:[#allocation5] sm:$0xff] %v23_v0  ;;  %s33_s12 = int_to_ptr.vmem [resolvable:$true] %s32_s12 }
   0x7   :  { %26 = vst [vmem:[#allocation5 + $0x8] sm:$0xff] %v24_v1 }
   0x8   :  { %37 = dma.vmem_to_hbm [thread:$0]  %s33_s12, 256, %s35_s15, [#allocation4]  }
   0x9   :  { %96 = dma.done.wait [#allocation4], 256  }
   0xa   :  { %97 = vsyncadd [#allocation4], 4294967040 }
   0xb   :  { %42 = vsyncpa [#allocation3], 1 }
   0xc   :  { %43 = vsyncpa [#allocation4], 1 }

</bundles_post_ra>
